<compile_context>
chip_gen: v6e
topology: v6e:2x2x1
jax: 0.10.0
libtpu: 0.0.40
codegen_flags: <defaults>
</compile_context>

<pallas_src>
import jax
import jax.numpy as jnp
from jax.experimental import pallas as pl
from jax.experimental.pallas import tpu as pltpu


# ---- packed slab layout: one (8, S*vocab) f32 VMEM tile ---------------------
#   rows 0:4, cols 0:S*vocab -> folded table T^T (4, S*vocab), lane-major
#   rows 4:8, cols  0:3      -> w2 (4, 3)
#   rows 4:7, cols  4:7      -> w3 (3, 3)
#   rows 4:7, cols  8:10     -> w4 (3, 2)
#   row  4,   cols 16:20     -> b1 (4,)
#   row  5,   cols 16:19     -> b2 (3,)
#   row  6,   cols 16:19     -> b3 (3,)
#   row  7,   cols 16:18     -> b4 (2,)
_SLAB_ROWS = 8


def fused_embed_mlp_kernel(x_ref, slab_ref, out_ref):
    B, S = x_ref.shape
    slab = slab_ref[...]                              # (8, S*vocab) f32
    SV = slab.shape[1]
    vocab = SV // S

    # ---- unpack packed parameters (static slices, zero-cost at this size) --
    t_tab = slab[0:4, :]                              # (4, SV) folded emb@W1
    w2 = slab[4:8, 0:3]                               # (4, 3)
    w3 = slab[4:7, 4:7]                               # (3, 3)
    w4 = slab[4:7, 8:10]                              # (3, 2)
    b1 = slab[4:5, 16:20]                             # (1, 4)
    b2 = slab[5:6, 16:19]                             # (1, 3)
    b3 = slab[6:7, 16:19]                             # (1, 3)
    b4 = slab[7:8, 16:18]                             # (1, 2)

    x = x_ref[...]                                    # (B, S) int32 token ids
    # NOTE: ids outside [0, vocab) yield an all-zero one-hot row (zero
    # embedding) instead of an index error like torch's nn.Embedding.

    # ---- one-hot over the flattened (position, token) axis ------------------
    # flat_id[b, s] = x[b, s] + s*vocab; the S positions hit disjoint lane
    # ranges, so summing the S indicator maps builds the full (B, SV) one-hot
    # with cheap, independent VPU compares — no gather, no reshape/relayout.
    lane = jax.lax.broadcasted_iota(jnp.int32, (B, SV), 1)
    onehot = jnp.zeros((B, SV), jnp.float32)
    for s in range(S):                                # static unroll, S small
        flat_id = x[:, s:s + 1] + s * vocab           # (B, 1)
        onehot = onehot + (lane == flat_id).astype(jnp.float32)

    # ---- layer 1: ONE MXU contraction against the lane-major folded table --
    # h1[b, o] = sum_l onehot[b, l] * t_tab[o, l]   (contract lane dims)
    h1 = jax.lax.dot_general(
        onehot, t_tab,
        dimension_numbers=(((1,), (1,)), ((), ())),
        preferred_element_type=jnp.float32) + b1      # (B, 4)
    h1 = jnp.maximum(h1, 0.0)

    # ---- layers 2-4 on the VPU: unrolled broadcast FMAs (din <= 4) ----------
    def small_linear(h, w, brow):
        z = jnp.zeros((h.shape[0], w.shape[1]), jnp.float32) + brow
        for i in range(w.shape[0]):                   # static unroll
            z = z + h[:, i:i + 1] * w[i:i + 1, :]
        return z

    h2 = jnp.maximum(small_linear(h1, w2, b2), 0.0)   # (B, 3)
    h3 = jnp.maximum(small_linear(h2, w3, b3), 0.0)   # (B, 3)
    z = small_linear(h3, w4, b4)                      # (B, 2) logits

    # ---- LogSoftmax(dim=1), numerically stable -------------------------------
    m = jnp.max(z, axis=-1, keepdims=True)
    zs = z - m
    lse = jnp.log(jnp.sum(jnp.exp(zs), axis=-1, keepdims=True))
    out_ref[...] = zs - lse                           # (B, 2)


def fold_and_pack(emb_matrix, params, sequence_length):
    """One-time init: fold the frozen embedding into W1 and pack everything
    (folded table + small weights + biases) into a single (8, S*vocab) slab.
    Must be re-run if W1 ever changes (inference-only assumption)."""
    vocab, emb_dim = emb_matrix.shape
    S = sequence_length
    SV = S * vocab
    assert SV >= 24, "slab needs at least 24 lanes for the small params"
    assert params["w1"].shape == (S * emb_dim, 4)

    w1 = params["w1"].reshape(S, emb_dim, 4)
    # T[s, v, o] = sum_e emb[v, e] * W1[s*E + e, o]
    folded = jnp.einsum("ve,seo->svo", emb_matrix, w1)        # (S, vocab, 4)
    t_tab = folded.reshape(SV, 4).T                            # (4, SV)

    slab = jnp.zeros((_SLAB_ROWS, SV), jnp.float32)
    slab = slab.at[0:4, :].set(t_tab)
    slab = slab.at[4:8, 0:3].set(params["w2"])
    slab = slab.at[4:7, 4:7].set(params["w3"])
    slab = slab.at[4:7, 8:10].set(params["w4"])
    slab = slab.at[4, 16:20].set(params["b1"][0])
    slab = slab.at[5, 16:19].set(params["b2"][0])
    slab = slab.at[6, 16:19].set(params["b3"][0])
    slab = slab.at[7, 16:18].set(params["b4"][0])
    return slab


def lstm_forward(X, slab):
    """X: int [B, S] token ids; slab: f32 [8, S*vocab] packed parameters.
    Returns log-probs [B, 2]."""
    B, S = X.shape
    assert slab.shape[0] == _SLAB_ROWS and slab.shape[1] % S == 0

    vmem = pl.BlockSpec(memory_space=pltpu.MemorySpace.VMEM)
    # Grid-less, single-core, whole-array VMEM residency: total live data
    # (incl. (8,128) tile padding) is < 64 KiB, so no grid / megacore split
    # is beneficial at this batch size on v5e/v6e/v7x.
    return pl.pallas_call(
        fused_embed_mlp_kernel,
        out_shape=jax.ShapeDtypeStruct((B, 2), jnp.float32),
        in_specs=[vmem, vmem],
        out_specs=vmem,
    )(X.astype(jnp.int32), slab)


def init_params(key, input_dim):
    """Deterministic synthetic init matching the nn.Sequential shapes.
    Weights are stored as (in, out) = transpose of torch's (out, in)."""
    dims = [(input_dim, 4), (4, 3), (3, 3), (3, 2)]
    params = {}
    for i, (din, dout) in enumerate(dims, start=1):
        key, kw, kb = jax.random.split(key, 3)
        scale = 1.0 / jnp.sqrt(jnp.float32(din))
        params[f"w{i}"] = jax.random.uniform(
            kw, (din, dout), jnp.float32, minval=-scale, maxval=scale)
        params[f"b{i}"] = jax.random.uniform(
            kb, (1, dout), jnp.float32, minval=-scale, maxval=scale)
    return params


if __name__ == "__main__":
    vocab_size = 100
    embedding_dim = 50
    sequence_length = 8
    batch = 8

    key = jax.random.PRNGKey(0)
    k_emb, k_x, k_params = jax.random.split(key, 3)

    # Frozen embedding matrix (stand-in for the emb_matrix numpy array).
    emb_matrix = jax.random.normal(k_emb, (vocab_size, embedding_dim),
                                   dtype=jnp.float32)
    # Integer token ids.
    X = jax.random.randint(k_x, (batch, sequence_length), 0, vocab_size,
                           dtype=jnp.int32)

    input_dim = sequence_length * embedding_dim   # 400
    params = init_params(k_params, input_dim)
    slab = fold_and_pack(emb_matrix, params, sequence_length)  # one-time init

    log_probs = lstm_forward(X, slab)
    jax.block_until_ready(log_probs)

    # Sanity: pure-JAX reference (embedding gather via jnp.take, unfused MLP).
    emb = jnp.take(emb_matrix, X, axis=0).reshape(batch, -1)
    h = jnp.maximum(emb @ params["w1"] + params["b1"], 0.0)
    h = jnp.maximum(h @ params["w2"] + params["b2"], 0.0)
    h = jnp.maximum(h @ params["w3"] + params["b3"], 0.0)
    z = h @ params["w4"] + params["b4"]
    ref = jax.nn.log_softmax(z, axis=1)

    assert log_probs.shape == (batch, 2)
    assert bool(jnp.allclose(log_probs, ref, atol=1e-4, rtol=1e-4)), (
        "Pallas kernel does not match JAX reference")

    print("KERNEL_OK")
</pallas_src>

<mosaic_0001>
module attributes {stable_mosaic.version = 11 : i64} {
  func.func @fused_embed_mlp_kernel(%arg0: memref<8x8xi32, #tpu.memory_space<vmem>>, %arg1: memref<8x800xf32, #tpu.memory_space<vmem>>, %arg2: memref<8x2xf32, #tpu.memory_space<vmem>>) attributes {dimension_semantics = [], scalar_prefetch = 0 : i64, scratch_operands = 0 : i64, tpu.core_type = #tpu.core_type<tc>} {
    %c0 = arith.constant 0 : index
    %c0_0 = arith.constant 0 : index
    %0 = vector.load %arg1[%c0, %c0_0] : memref<8x800xf32, #tpu.memory_space<vmem>>, vector<8x800xf32>
    %1 = vector.extract_strided_slice %0 {offsets = [0, 0], sizes = [4, 800], strides = [1, 1]} : vector<8x800xf32> to vector<4x800xf32>
    %2 = vector.extract_strided_slice %0 {offsets = [4, 0], sizes = [4, 3], strides = [1, 1]} : vector<8x800xf32> to vector<4x3xf32>
    %3 = vector.extract_strided_slice %0 {offsets = [4, 4], sizes = [3, 3], strides = [1, 1]} : vector<8x800xf32> to vector<3x3xf32>
    %4 = vector.extract_strided_slice %0 {offsets = [4, 8], sizes = [3, 2], strides = [1, 1]} : vector<8x800xf32> to vector<3x2xf32>
    %5 = vector.extract_strided_slice %0 {offsets = [4, 16], sizes = [1, 4], strides = [1, 1]} : vector<8x800xf32> to vector<1x4xf32>
    %6 = vector.extract_strided_slice %0 {offsets = [5, 16], sizes = [1, 3], strides = [1, 1]} : vector<8x800xf32> to vector<1x3xf32>
    %7 = vector.extract_strided_slice %0 {offsets = [6, 16], sizes = [1, 3], strides = [1, 1]} : vector<8x800xf32> to vector<1x3xf32>
    %8 = vector.extract_strided_slice %0 {offsets = [7, 16], sizes = [1, 2], strides = [1, 1]} : vector<8x800xf32> to vector<1x2xf32>
    %c0_1 = arith.constant 0 : index
    %c0_2 = arith.constant 0 : index
    %9 = vector.load %arg0[%c0_1, %c0_2] : memref<8x8xi32, #tpu.memory_space<vmem>>, vector<8x8xi32>
    %10 = tpu.iota {dimensions = array<i32: 1>} : vector<8x800xi32>
    %cst = arith.constant 0.000000e+00 : f32
    %11 = vector.broadcast %cst : f32 to vector<8x800xf32>
    %12 = vector.extract_strided_slice %9 {offsets = [0, 0], sizes = [8, 1], strides = [1, 1]} : vector<8x8xi32> to vector<8x1xi32>
    %c0_i32 = arith.constant 0 : i32
    %13 = vector.broadcast %c0_i32 : i32 to vector<8x1xi32>
    %14 = arith.addi %12, %13 : vector<8x1xi32>
    %15 = vector.broadcast %14 : vector<8x1xi32> to vector<8x800xi32>
    %16 = arith.cmpi eq, %10, %15 : vector<8x800xi32>
    %17 = arith.extui %16 : vector<8x800xi1> to vector<8x800xi32>
    %18 = arith.sitofp %17 : vector<8x800xi32> to vector<8x800xf32>
    %19 = arith.addf %11, %18 : vector<8x800xf32>
    %20 = vector.extract_strided_slice %9 {offsets = [0, 1], sizes = [8, 1], strides = [1, 1]} : vector<8x8xi32> to vector<8x1xi32>
    %c100_i32 = arith.constant 100 : i32
    %21 = vector.broadcast %c100_i32 : i32 to vector<8x1xi32>
    %22 = arith.addi %20, %21 : vector<8x1xi32>
    %23 = vector.broadcast %22 : vector<8x1xi32> to vector<8x800xi32>
    %24 = arith.cmpi eq, %10, %23 : vector<8x800xi32>
    %25 = arith.extui %24 : vector<8x800xi1> to vector<8x800xi32>
    %26 = arith.sitofp %25 : vector<8x800xi32> to vector<8x800xf32>
    %27 = arith.addf %19, %26 : vector<8x800xf32>
    %28 = vector.extract_strided_slice %9 {offsets = [0, 2], sizes = [8, 1], strides = [1, 1]} : vector<8x8xi32> to vector<8x1xi32>
    %c200_i32 = arith.constant 200 : i32
    %29 = vector.broadcast %c200_i32 : i32 to vector<8x1xi32>
    %30 = arith.addi %28, %29 : vector<8x1xi32>
    %31 = vector.broadcast %30 : vector<8x1xi32> to vector<8x800xi32>
    %32 = arith.cmpi eq, %10, %31 : vector<8x800xi32>
    %33 = arith.extui %32 : vector<8x800xi1> to vector<8x800xi32>
    %34 = arith.sitofp %33 : vector<8x800xi32> to vector<8x800xf32>
    %35 = arith.addf %27, %34 : vector<8x800xf32>
    %36 = vector.extract_strided_slice %9 {offsets = [0, 3], sizes = [8, 1], strides = [1, 1]} : vector<8x8xi32> to vector<8x1xi32>
    %c300_i32 = arith.constant 300 : i32
    %37 = vector.broadcast %c300_i32 : i32 to vector<8x1xi32>
    %38 = arith.addi %36, %37 : vector<8x1xi32>
    %39 = vector.broadcast %38 : vector<8x1xi32> to vector<8x800xi32>
    %40 = arith.cmpi eq, %10, %39 : vector<8x800xi32>
    %41 = arith.extui %40 : vector<8x800xi1> to vector<8x800xi32>
    %42 = arith.sitofp %41 : vector<8x800xi32> to vector<8x800xf32>
    %43 = arith.addf %35, %42 : vector<8x800xf32>
    %44 = vector.extract_strided_slice %9 {offsets = [0, 4], sizes = [8, 1], strides = [1, 1]} : vector<8x8xi32> to vector<8x1xi32>
    %c400_i32 = arith.constant 400 : i32
    %45 = vector.broadcast %c400_i32 : i32 to vector<8x1xi32>
    %46 = arith.addi %44, %45 : vector<8x1xi32>
    %47 = vector.broadcast %46 : vector<8x1xi32> to vector<8x800xi32>
    %48 = arith.cmpi eq, %10, %47 : vector<8x800xi32>
    %49 = arith.extui %48 : vector<8x800xi1> to vector<8x800xi32>
    %50 = arith.sitofp %49 : vector<8x800xi32> to vector<8x800xf32>
    %51 = arith.addf %43, %50 : vector<8x800xf32>
    %52 = vector.extract_strided_slice %9 {offsets = [0, 5], sizes = [8, 1], strides = [1, 1]} : vector<8x8xi32> to vector<8x1xi32>
    %c500_i32 = arith.constant 500 : i32
    %53 = vector.broadcast %c500_i32 : i32 to vector<8x1xi32>
    %54 = arith.addi %52, %53 : vector<8x1xi32>
    %55 = vector.broadcast %54 : vector<8x1xi32> to vector<8x800xi32>
    %56 = arith.cmpi eq, %10, %55 : vector<8x800xi32>
    %57 = arith.extui %56 : vector<8x800xi1> to vector<8x800xi32>
    %58 = arith.sitofp %57 : vector<8x800xi32> to vector<8x800xf32>
    %59 = arith.addf %51, %58 : vector<8x800xf32>
    %60 = vector.extract_strided_slice %9 {offsets = [0, 6], sizes = [8, 1], strides = [1, 1]} : vector<8x8xi32> to vector<8x1xi32>
    %c600_i32 = arith.constant 600 : i32
    %61 = vector.broadcast %c600_i32 : i32 to vector<8x1xi32>
    %62 = arith.addi %60, %61 : vector<8x1xi32>
    %63 = vector.broadcast %62 : vector<8x1xi32> to vector<8x800xi32>
    %64 = arith.cmpi eq, %10, %63 : vector<8x800xi32>
    %65 = arith.extui %64 : vector<8x800xi1> to vector<8x800xi32>
    %66 = arith.sitofp %65 : vector<8x800xi32> to vector<8x800xf32>
    %67 = arith.addf %59, %66 : vector<8x800xf32>
    %68 = vector.extract_strided_slice %9 {offsets = [0, 7], sizes = [8, 1], strides = [1, 1]} : vector<8x8xi32> to vector<8x1xi32>
    %c700_i32 = arith.constant 700 : i32
    %69 = vector.broadcast %c700_i32 : i32 to vector<8x1xi32>
    %70 = arith.addi %68, %69 : vector<8x1xi32>
    %71 = vector.broadcast %70 : vector<8x1xi32> to vector<8x800xi32>
    %72 = arith.cmpi eq, %10, %71 : vector<8x800xi32>
    %73 = arith.extui %72 : vector<8x800xi1> to vector<8x800xi32>
    %74 = arith.sitofp %73 : vector<8x800xi32> to vector<8x800xf32>
    %75 = arith.addf %67, %74 : vector<8x800xf32>
    %cst_3 = arith.constant dense<0.000000e+00> : vector<8x4xf32>
    %76 = tpu.matmul %75, %1, %cst_3 {dimension_numbers = #tpu.dot_dimension_numbers<[1], [1], [0], [0], [0, 0, 1, 0], [], []>} : vector<8x800xf32>, vector<4x800xf32>, vector<8x4xf32> -> vector<8x4xf32>
    %77 = vector.broadcast %5 : vector<1x4xf32> to vector<8x4xf32>
    %78 = arith.addf %76, %77 : vector<8x4xf32>
    %cst_4 = arith.constant 0.000000e+00 : f32
    %79 = vector.broadcast %cst_4 : f32 to vector<8x4xf32>
    %80 = arith.maximumf %78, %79 : vector<8x4xf32>
    %cst_5 = arith.constant 0.000000e+00 : f32
    %81 = vector.broadcast %cst_5 : f32 to vector<8x3xf32>
    %82 = vector.broadcast %6 : vector<1x3xf32> to vector<8x3xf32>
    %83 = arith.addf %81, %82 : vector<8x3xf32>
    %84 = vector.extract_strided_slice %80 {offsets = [0, 0], sizes = [8, 1], strides = [1, 1]} : vector<8x4xf32> to vector<8x1xf32>
    %85 = vector.extract_strided_slice %2 {offsets = [0, 0], sizes = [1, 3], strides = [1, 1]} : vector<4x3xf32> to vector<1x3xf32>
    %86 = vector.broadcast %84 : vector<8x1xf32> to vector<8x3xf32>
    %87 = vector.broadcast %85 : vector<1x3xf32> to vector<8x3xf32>
    %88 = arith.mulf %86, %87 : vector<8x3xf32>
    %89 = arith.addf %83, %88 : vector<8x3xf32>
    %90 = vector.extract_strided_slice %80 {offsets = [0, 1], sizes = [8, 1], strides = [1, 1]} : vector<8x4xf32> to vector<8x1xf32>
    %91 = vector.extract_strided_slice %2 {offsets = [1, 0], sizes = [1, 3], strides = [1, 1]} : vector<4x3xf32> to vector<1x3xf32>
    %92 = vector.broadcast %90 : vector<8x1xf32> to vector<8x3xf32>
    %93 = vector.broadcast %91 : vector<1x3xf32> to vector<8x3xf32>
    %94 = arith.mulf %92, %93 : vector<8x3xf32>
    %95 = arith.addf %89, %94 : vector<8x3xf32>
    %96 = vector.extract_strided_slice %80 {offsets = [0, 2], sizes = [8, 1], strides = [1, 1]} : vector<8x4xf32> to vector<8x1xf32>
    %97 = vector.extract_strided_slice %2 {offsets = [2, 0], sizes = [1, 3], strides = [1, 1]} : vector<4x3xf32> to vector<1x3xf32>
    %98 = vector.broadcast %96 : vector<8x1xf32> to vector<8x3xf32>
    %99 = vector.broadcast %97 : vector<1x3xf32> to vector<8x3xf32>
    %100 = arith.mulf %98, %99 : vector<8x3xf32>
    %101 = arith.addf %95, %100 : vector<8x3xf32>
    %102 = vector.extract_strided_slice %80 {offsets = [0, 3], sizes = [8, 1], strides = [1, 1]} : vector<8x4xf32> to vector<8x1xf32>
    %103 = vector.extract_strided_slice %2 {offsets = [3, 0], sizes = [1, 3], strides = [1, 1]} : vector<4x3xf32> to vector<1x3xf32>
    %104 = vector.broadcast %102 : vector<8x1xf32> to vector<8x3xf32>
    %105 = vector.broadcast %103 : vector<1x3xf32> to vector<8x3xf32>
    %106 = arith.mulf %104, %105 : vector<8x3xf32>
    %107 = arith.addf %101, %106 : vector<8x3xf32>
    %cst_6 = arith.constant 0.000000e+00 : f32
    %108 = vector.broadcast %cst_6 : f32 to vector<8x3xf32>
    %109 = arith.maximumf %107, %108 : vector<8x3xf32>
    %cst_7 = arith.constant 0.000000e+00 : f32
    %110 = vector.broadcast %cst_7 : f32 to vector<8x3xf32>
    %111 = vector.broadcast %7 : vector<1x3xf32> to vector<8x3xf32>
    %112 = arith.addf %110, %111 : vector<8x3xf32>
    %113 = vector.extract_strided_slice %109 {offsets = [0, 0], sizes = [8, 1], strides = [1, 1]} : vector<8x3xf32> to vector<8x1xf32>
    %114 = vector.extract_strided_slice %3 {offsets = [0, 0], sizes = [1, 3], strides = [1, 1]} : vector<3x3xf32> to vector<1x3xf32>
    %115 = vector.broadcast %113 : vector<8x1xf32> to vector<8x3xf32>
    %116 = vector.broadcast %114 : vector<1x3xf32> to vector<8x3xf32>
    %117 = arith.mulf %115, %116 : vector<8x3xf32>
    %118 = arith.addf %112, %117 : vector<8x3xf32>
    %119 = vector.extract_strided_slice %109 {offsets = [0, 1], sizes = [8, 1], strides = [1, 1]} : vector<8x3xf32> to vector<8x1xf32>
    %120 = vector.extract_strided_slice %3 {offsets = [1, 0], sizes = [1, 3], strides = [1, 1]} : vector<3x3xf32> to vector<1x3xf32>
    %121 = vector.broadcast %119 : vector<8x1xf32> to vector<8x3xf32>
    %122 = vector.broadcast %120 : vector<1x3xf32> to vector<8x3xf32>
    %123 = arith.mulf %121, %122 : vector<8x3xf32>
    %124 = arith.addf %118, %123 : vector<8x3xf32>
    %125 = vector.extract_strided_slice %109 {offsets = [0, 2], sizes = [8, 1], strides = [1, 1]} : vector<8x3xf32> to vector<8x1xf32>
    %126 = vector.extract_strided_slice %3 {offsets = [2, 0], sizes = [1, 3], strides = [1, 1]} : vector<3x3xf32> to vector<1x3xf32>
    %127 = vector.broadcast %125 : vector<8x1xf32> to vector<8x3xf32>
    %128 = vector.broadcast %126 : vector<1x3xf32> to vector<8x3xf32>
    %129 = arith.mulf %127, %128 : vector<8x3xf32>
    %130 = arith.addf %124, %129 : vector<8x3xf32>
    %cst_8 = arith.constant 0.000000e+00 : f32
    %131 = vector.broadcast %cst_8 : f32 to vector<8x3xf32>
    %132 = arith.maximumf %130, %131 : vector<8x3xf32>
    %cst_9 = arith.constant 0.000000e+00 : f32
    %133 = vector.broadcast %cst_9 : f32 to vector<8x2xf32>
    %134 = vector.broadcast %8 : vector<1x2xf32> to vector<8x2xf32>
    %135 = arith.addf %133, %134 : vector<8x2xf32>
    %136 = vector.extract_strided_slice %132 {offsets = [0, 0], sizes = [8, 1], strides = [1, 1]} : vector<8x3xf32> to vector<8x1xf32>
    %137 = vector.extract_strided_slice %4 {offsets = [0, 0], sizes = [1, 2], strides = [1, 1]} : vector<3x2xf32> to vector<1x2xf32>
    %138 = vector.broadcast %136 : vector<8x1xf32> to vector<8x2xf32>
    %139 = vector.broadcast %137 : vector<1x2xf32> to vector<8x2xf32>
    %140 = arith.mulf %138, %139 : vector<8x2xf32>
    %141 = arith.addf %135, %140 : vector<8x2xf32>
    %142 = vector.extract_strided_slice %132 {offsets = [0, 1], sizes = [8, 1], strides = [1, 1]} : vector<8x3xf32> to vector<8x1xf32>
    %143 = vector.extract_strided_slice %4 {offsets = [1, 0], sizes = [1, 2], strides = [1, 1]} : vector<3x2xf32> to vector<1x2xf32>
    %144 = vector.broadcast %142 : vector<8x1xf32> to vector<8x2xf32>
    %145 = vector.broadcast %143 : vector<1x2xf32> to vector<8x2xf32>
    %146 = arith.mulf %144, %145 : vector<8x2xf32>
    %147 = arith.addf %141, %146 : vector<8x2xf32>
    %148 = vector.extract_strided_slice %132 {offsets = [0, 2], sizes = [8, 1], strides = [1, 1]} : vector<8x3xf32> to vector<8x1xf32>
    %149 = vector.extract_strided_slice %4 {offsets = [2, 0], sizes = [1, 2], strides = [1, 1]} : vector<3x2xf32> to vector<1x2xf32>
    %150 = vector.broadcast %148 : vector<8x1xf32> to vector<8x2xf32>
    %151 = vector.broadcast %149 : vector<1x2xf32> to vector<8x2xf32>
    %152 = arith.mulf %150, %151 : vector<8x2xf32>
    %153 = arith.addf %147, %152 : vector<8x2xf32>
    %cst_10 = arith.constant dense<0xFF800000> : vector<8xf32>
    %154 = vector.multi_reduction <maximumf>, %153, %cst_10 [1] : vector<8x2xf32> to vector<8xf32>
    %155 = vector.shape_cast %154 : vector<8xf32> to vector<8x1xf32>
    %156 = vector.broadcast %155 : vector<8x1xf32> to vector<8x2xf32>
    %157 = arith.subf %153, %156 : vector<8x2xf32>
    %158 = math.exp %157 : vector<8x2xf32>
    %cst_11 = arith.constant dense<0.000000e+00> : vector<8xf32>
    %159 = vector.multi_reduction <add>, %158, %cst_11 [1] : vector<8x2xf32> to vector<8xf32>
    %160 = vector.shape_cast %159 : vector<8xf32> to vector<8x1xf32>
    %161 = math.log %160 : vector<8x1xf32>
    %162 = vector.broadcast %161 : vector<8x1xf32> to vector<8x2xf32>
    %163 = arith.subf %157, %162 : vector<8x2xf32>
    %c0_12 = arith.constant 0 : index
    %c0_13 = arith.constant 0 : index
    %164 = vector.load %arg2[%c0_12, %c0_13] : memref<8x2xf32, #tpu.memory_space<vmem>>, vector<8x2xf32>
    tpu.vector_store %arg2[%c0_12, %c0_13], %163 {strides = array<i32>} : memref<8x2xf32, #tpu.memory_space<vmem>>, vector<8x2xf32>,
    return
  }
}

</mosaic_0001>

<bundles_post_ra>
// kernel: tpu_custom_call.1
= control target key start
LH: loop header
LB: loop body
LE: loop exit
PB: predicated region body
PF: predicated region fallthrough
CT: control target
= control target key end

     0   :  { %7 = vsyncpa [#allocation3], 0  ;;  %s1212_s0 = inlined_call_operand.hbm [shape: s32[8,8], index: 0, kind: input, shape index: {}]   ;;  %s1213_s1 = inlined_call_operand.hbm [shape: f32[8,800], index: 1, kind: input, shape index: {}]   ;;  %s1214_s2 = inlined_call_operand.vmem [shape: f32[8,2], index: 2, kind: output, shape index: {}]  }
   0x1   :  { %8 = vsyncpa [#allocation5], 0  ;;  %s902_s9 = smov [#allocation2]   ;;  %s903_s11 = smov [#allocation4]  }
   0x2   :  { %s15_s10 = sshll.u32 %s902_s9, 4  ;;  %s25_s12 = sshll.u32 %s903_s11, 4  ;;  %s16_s10 = int_to_ptr.vmem [resolvable:$true] %s15_s10  ;;  %s26_s12 = int_to_ptr.vmem [resolvable:$true] %s25_s12 }
   0x3   :  { %s866_s13 = scalar_lea.vmem %s16_s10, 128  ;;  %p871_p1 = scmp.lt.s32.totalorder %s16_s10, %s16_s10 }
   0x4   :  { %p867_p0 = scmp.ne.s32.totalorder %s16_s10, %s866_s13  ;;  %p872_p2 = scmp.lt.s32.totalorder %s866_s13, %s866_s13 }
   0x6   :  { %p873_p3 = por %p872_p2, %p871_p1 }
   0x8   :  { %p874_p4 = pnand %p873_p3, %p867_p0 }
   0xa   :  { %877 = shalt.err (!%p874_p4)
}
   0xb   :  { %18 = dma.hbm_to_vmem [thread:$0]  %s1212_s0, 128, %s16_s10, [#allocation3]  }
   0xc   :  { %s886_s16 = scalar_lea.vmem %s26_s12, 896  ;;  %p891_p6 = scmp.lt.s32.totalorder %s26_s12, %s26_s12 }
   0xd   :  { %p887_p5 = scmp.ne.s32.totalorder %s26_s12, %s886_s16  ;;  %p892_p7 = scmp.lt.s32.totalorder %s886_s16, %s886_s16 }
   0xf   :  { %p893_p8 = por %p892_p7, %p891_p6 }
  0x11   :  { %p894_p9 = pnand %p893_p8, %p887_p5 }
  0x13   :  { %897 = shalt.err (!%p894_p9)
}
  0x14   :  { %28 = dma.hbm_to_vmem [thread:$0]  %s1213_s1, 896, %s26_s12, [#allocation5]  }
  0x15   :  { %898 = dma.done.wait [#allocation3], 128  }
  0x16   :  { %899 = vsyncadd [#allocation3], 4294967168 }
  0x17   :  { %900 = dma.done.wait [#allocation5], 896  }
  0x18   :  { %901 = vsyncadd [#allocation5], 4294966400  ;;  %v904_v0 = vmov 0   ;;  %v905_v1 = vmov 2   ;;  %v42_v2 = vld [vmem:[#allocation2] sm:$0xff]  ;;  %v906_v6 = vmov 1   ;;  %v43_v22 = vlaneseq }
  0x19   :  { %835 = vset.pattern.permute.xlu0 %v904_v0  ;;  %837 = vset.pattern.permute.xlu1 %v905_v1  ;;  %v114_v3 = vadd.s32 200, %v42_v2  ;;  %v82_v4 = vadd.s32 100, %v42_v2  ;;  %v146_v5 = vadd.s32 300, %v42_v2  ;;  %v907_v7 = vmov 3   ;;  %v36_v14 = vld [vmem:[#allocation4 + $0x8] sm:$0xff]  ;;  %v944_v15 = vld [vmem:[#allocation4] sm:$0xff] }
  0x1a   :  { %52 = vperm.xlu0 %835, %v42_v2   ;;  %v210_v8 = vadd.s32 500, %v42_v2  ;;  %v178_v9 = vadd.s32 400, %v42_v2  ;;  %v908_v10 = vmov 5   ;;  %v909_v11 = vmov 4   ;;  %v38_v16 = vld [vmem:[#allocation4 + $0x18] sm:$0xff]  ;;  %351 = vmatprep.subr.mxu0 %v36_v14  ;;  %v37_v18 = vld [vmem:[#allocation4 + $0x10] sm:$0xff] }
  0x1b   :  { %116 = vperm.xlu1 %837, %v114_v3   ;;  %v242_v12 = vadd.s32 600, %v42_v2  ;;  %v910_v13 = vmov 6   ;;  %v274_v17 = vadd.s32 700, %v42_v2  ;;  %421 = vmatprep.subr.mxu1 %v38_v16  ;;  %v911_v19 = vmov 0.0   ;;  %v40_v21 = vld [vmem:[#allocation4 + $0x28] sm:$0xff]  ;;  %s913_s0 = smov 112  }
  0x1c   :  { %352 = vmatpush1.xpose.msra.mxu0 %v944_v15  ;;  %422 = vmatpush1.xpose.msra.mxu1 %v37_v18  ;;  %v912_v20 = vmov 7   ;;  %v948_v23 = vshrl.u32 %v43_v22, 7  ;;  %v956_v26 = vand.u32 127, %v43_v22  ;;  %s915_s1 = smov 16   ;;  %s919_s19 = smov 12  }
  0x1d   :  { %811 = vmatprep.subr.mxu1 %v911_v19  ;;  %491 = vmatprep.subr.mxu0 %v40_v21  ;;  %s920_s20 = smov 8  }
  0x1e   :  { %836 = vset.pattern.permute.xlu0 %v906_v6  ;;  %v308_v24 = vsub.s32 4, %v948_v23  ;;  %v959_v27 = vadd.s32 256, %v956_v26  ;;  %v962_v28 = vadd.s32 512, %v956_v26  ;;  %v965_v29 = vadd.s32 640, %v956_v26 }
  0x1f   :  { %84 = vperm.xlu0 %836, %v82_v4   ;;  %838 = vset.pattern.permute.xlu1 %v907_v7  ;;  %v968_v30 = vadd.s32 768, %v956_v26  ;;  %v981_v34 = vadd.s32 128, %v956_v26  ;;  %v984_v35 = vadd.s32 384, %v956_v26 }
  0x20   :  { %148 = vperm.xlu1 %838, %v146_v5   ;;  %v952_v25 = vrot.slane %v944_v15, %v308_v24 }
  0x23   :  { %840 = vset.pattern.permute.xlu0 %v908_v10 }
  0x24   :  { %212 = vperm.xlu0 %840, %v210_v8   ;;  %839 = vset.pattern.permute.xlu1 %v909_v11 }
  0x25   :  { %180 = vperm.xlu1 %839, %v178_v9  }
  0x28   :  { %844 = vset.pattern.permute.xlu0 %v906_v6 }
  0x29   :  { %841 = vset.pattern.permute.xlu1 %v910_v13  ;;  %311 = vrot.lane.b32.xlu0 %v952_v25, %s913_s0 }
  0x2a   :  { %244 = vperm.xlu1 %841, %v242_v12  }
  0x2e   :  { %842 = vset.pattern.permute.xlu1 %v912_v20 }
  0x2f   :  { %276 = vperm.xlu1 %842, %v274_v17  }
  0x33   :  { %843 = vset.pattern.permute.xlu1 %v904_v0 }
  0x95   :  { %v53_v31 = vpop.permute.xlu0 %52 }
  0x96   :  { %vm54_vm0 = vcmp.eq.s32.totalorder %v956_v26, %v53_v31  ;;  %vm56_vm1 = vcmp.eq.s32.totalorder %v959_v27, %v53_v31  ;;  %vm58_vm2 = vcmp.eq.s32.totalorder %v962_v28, %v53_v31  ;;  %vm59_vm3 = vcmp.eq.s32.totalorder %v965_v29, %v53_v31  ;;  %v975_v32 = vpop.permute.xlu1 %116 }
  0x97   :  { %vm60_vm4 = vcmp.eq.s32.totalorder %v968_v30, %v53_v31  ;;  %v978_v33 = vsel %vm54_vm0, 1.0, %v911_v19  ;;  %v987_v36 = vsel %vm56_vm1, 1.0, %v911_v19  ;;  %v755_v37 = vsel %vm58_vm2, 1.0, %v911_v19 }
  0x98   :  { %vm122_vm5 = vcmp.eq.s32.totalorder %v962_v28, %v975_v32  ;;  %vm124_vm6 = vcmp.eq.s32.totalorder %v968_v30, %v975_v32  ;;  %v995_v38 = vsel %vm59_vm3, 1.0, %v911_v19  ;;  %v757_v39 = vsel %vm60_vm4, 1.0, %v911_v19 }
  0x99   :  { %v999_v40 = vsel %vm122_vm5, 1.0, %v911_v19  ;;  %vm55_vm7 = vcmp.eq.s32.totalorder %v981_v34, %v53_v31  ;;  %v771_v42 = vsel %vm124_vm6, 1.0, %v911_v19  ;;  %vm119_vm13 = vcmp.eq.s32.totalorder %v981_v34, %v975_v32 }
  0x9a   :  { %v85_v41 = vpop.permute.xlu0 %84  ;;  %v752_v48 = vsel %vm55_vm7, 1.0, %v911_v19  ;;  %vm118_vm0 = vcmp.eq.s32.totalorder %v956_v26, %v975_v32  ;;  %v766_v54 = vsel %vm119_vm13, 1.0, %v911_v19  ;;  %vm57_vm1 = vcmp.eq.s32.totalorder %v984_v35, %v53_v31 }
  0x9b   :  { %vm86_vm8 = vcmp.eq.s32.totalorder %v956_v26, %v85_v41  ;;  %vm88_vm9 = vcmp.eq.s32.totalorder %v959_v27, %v85_v41  ;;  %vm90_vm10 = vcmp.eq.s32.totalorder %v962_v28, %v85_v41  ;;  %vm91_vm11 = vcmp.eq.s32.totalorder %v965_v29, %v85_v41  ;;  %v1009_v44 = vpop.permute.xlu1 %148 }
  0x9c   :  { %vm92_vm12 = vcmp.eq.s32.totalorder %v968_v30, %v85_v41  ;;  %v762_v43 = vsel %vm90_vm10, 1.0, %v911_v19  ;;  %v758_v45 = vsel %vm86_vm8, 1.0, %v911_v19  ;;  %v1015_v46 = vsel %vm88_vm9, 1.0, %v911_v19 }
  0x9d   :  { %v764_v47 = vsel %vm92_vm12, 1.0, %v911_v19  ;;  %v1020_v49 = vsel %vm91_vm11, 1.0, %v911_v19  ;;  %vm156_vm14 = vcmp.eq.s32.totalorder %v968_v30, %v1009_v44  ;;  %vm87_vm15 = vcmp.eq.s32.totalorder %v981_v34, %v85_v41 }
  0x9e   :  { %v113_v50 = vadd.f32 %v764_v47, %v757_v39  ;;  %v1027_v51 = vadd.f32 %v762_v43, %v755_v37  ;;  %v759_v53 = vsel %vm87_vm15, 1.0, %v911_v19  ;;  %v778_v56 = vsel %vm156_vm14, 1.0, %v911_v19 }
  0x9f   :  { %v1029_v52 = vpop.permute.xlu0 %212  ;;  %v108_v57 = vadd.f32 %v759_v53, %v752_v48  ;;  %vm151_vm2 = vcmp.eq.s32.totalorder %v981_v34, %v1009_v44  ;;  %v754_v59 = vsel %vm57_vm1, 1.0, %v911_v19  ;;  %vm89_vm5 = vcmp.eq.s32.totalorder %v984_v35, %v85_v41 }
  0xa0   :  { %v145_v55 = vadd.f32 %v771_v42, %v113_v50  ;;  %v1037_v58 = vpop.permute.xlu1 %180  ;;  %vm220_vm3 = vcmp.eq.s32.totalorder %v968_v30, %v1029_v52  ;;  %vm215_vm4 = vcmp.eq.s32.totalorder %v981_v34, %v1029_v52  ;;  %vm120_vm8 = vcmp.eq.s32.totalorder %v959_v27, %v975_v32 }
  0xa1   :  { %vm188_vm6 = vcmp.eq.s32.totalorder %v968_v30, %v1037_v58  ;;  %v140_v61 = vadd.f32 %v766_v54, %v108_v57  ;;  %vm183_vm7 = vcmp.eq.s32.totalorder %v981_v34, %v1037_v58  ;;  %v773_v63 = vsel %vm151_vm2, 1.0, %v911_v19 }
  0xa2   :  { %v177_v60 = vadd.f32 %v778_v56, %v145_v55  ;;  %v785_v62 = vsel %vm188_vm6, 1.0, %v911_v19  ;;  %v780_v0 = vsel %vm183_vm7, 1.0, %v911_v19  ;;  %v761_v2 = vsel %vm89_vm5, 1.0, %v911_v19 }
  0xa3   :  { %v172_v3 = vadd.f32 %v773_v63, %v140_v61  ;;  %v787_v4 = vsel %vm215_vm4, 1.0, %v911_v19  ;;  %v110_v5 = vadd.f32 %v761_v2, %v754_v59  ;;  %vm121_vm9 = vcmp.eq.s32.totalorder %v984_v35, %v975_v32 }
  0xa4   :  { %v768_v6 = vsel %vm121_vm9, 1.0, %v911_v19  ;;  %vm153_vm10 = vcmp.eq.s32.totalorder %v984_v35, %v1009_v44  ;;  %vm185_vm11 = vcmp.eq.s32.totalorder %v984_v35, %v1037_v58  ;;  %vm217_vm12 = vcmp.eq.s32.totalorder %v984_v35, %v1029_v52 }
  0xa5   :  { %v1065_v8 = vadd.f32 %v785_v62, %v177_v60  ;;  %v1071_v9 = vsel %vm220_vm3, 1.0, %v911_v19  ;;  %v1073_v10 = vpop.permute.xlu1 %244  ;;  %v204_v11 = vadd.f32 %v780_v0, %v172_v3  ;;  %v142_v12 = vadd.f32 %v768_v6, %v110_v5  ;;  %v39_v6 = vld [vmem:[#allocation4 + $0x20] sm:$0xff] }
  0xa6   :  { %vm247_vm13 = vcmp.eq.s32.totalorder %v981_v34, %v1073_v10  ;;  %v775_v13 = vsel %vm153_vm10, 1.0, %v911_v19  ;;  %v782_v14 = vsel %vm185_vm11, 1.0, %v911_v19  ;;  %vm249_vm14 = vcmp.eq.s32.totalorder %v984_v35, %v1073_v10 }
  0xa7   :  { %vm123_vm15 = vcmp.eq.s32.totalorder %v965_v29, %v975_v32  ;;  %v236_v16 = vadd.f32 %v787_v4, %v204_v11  ;;  %v794_v17 = vsel %vm247_vm13, 1.0, %v911_v19  ;;  %v174_v18 = vadd.f32 %v775_v13, %v142_v12 }
  0xa8   :  { %v789_v20 = vsel %vm217_vm12, 1.0, %v911_v19  ;;  %v796_v21 = vsel %vm249_vm14, 1.0, %v911_v19  ;;  %v107_v22 = vadd.f32 %v758_v45, %v978_v33  ;;  %vm150_vm1 = vcmp.eq.s32.totalorder %v956_v26, %v1009_v44 }
  0xa9   :  { %vm182_vm2 = vcmp.eq.s32.totalorder %v956_v26, %v1037_v58  ;;  %v268_v24 = vadd.f32 %v794_v17, %v236_v16  ;;  %v206_v31 = vadd.f32 %v782_v14, %v174_v18  ;;  %v765_v37 = vsel %vm118_vm0, 1.0, %v911_v19 }
  0xaa   :  { %v772_v39 = vsel %vm150_vm1, 1.0, %v911_v19  ;;  %v1096_v41 = vpop.permute.xlu1 %276  ;;  %v139_v42 = vadd.f32 %v765_v37, %v107_v22  ;;  %v779_v33 = vsel %vm182_vm2, 1.0, %v911_v19  ;;  %vm214_vm3 = vcmp.eq.s32.totalorder %v956_v26, %v1029_v52  ;;  %v41_v22 = vld [vmem:[#allocation4 + $0x30] sm:$0xff] }
  0xab   :  { %v109_v43 = vadd.f32 %v1015_v46, %v987_v36  ;;  %vm279_vm4 = vcmp.eq.s32.totalorder %v981_v34, %v1096_v41  ;;  %v238_v45 = vadd.f32 %v789_v20, %v206_v31  ;;  %vm281_vm0 = vcmp.eq.s32.totalorder %v984_v35, %v1096_v41 }
  0xac   :  { %vm246_vm5 = vcmp.eq.s32.totalorder %v956_v26, %v1073_v10  ;;  %vm154_vm6 = vcmp.eq.s32.totalorder %v962_v28, %v1009_v44  ;;  %v801_v47 = vsel %vm279_vm4, 1.0, %v911_v19  ;;  %v803_v48 = vsel %vm281_vm0, 1.0, %v911_v19 }
  0xad   :  { %v171_v50 = vadd.f32 %v772_v39, %v139_v42  ;;  %v786_v36 = vsel %vm214_vm3, 1.0, %v911_v19  ;;  %v300_v46 = vadd.f32 %v801_v47, %v268_v24  ;;  %v270_v53 = vadd.f32 %v796_v21, %v238_v45 }
  0xae   :  { %vm278_vm7 = vcmp.eq.s32.totalorder %v956_v26, %v1096_v41  ;;  %v767_v34 = vsel %vm120_vm8, 1.0, %v911_v19  ;;  %v793_v54 = vsel %vm246_vm5, 1.0, %v911_v19  ;;  %vm152_vm9 = vcmp.eq.s32.totalorder %v959_v27, %v1009_v44 }
  0xaf   :  { %v203_v35 = vadd.f32 %v779_v33, %v171_v50  ;;  %v141_v55 = vadd.f32 %v767_v34, %v109_v43  ;;  %385 = vmatprep.mubr.f32.mxu0 %v300_v46  ;;  %v302_v56 = vadd.f32 %v803_v48, %v270_v53  ;;  %v774_v57 = vsel %vm152_vm9, 1.0, %v911_v19  ;;  %v312_v48 = vpop.permute.xlu0 %311 }
  0xb0   :  { %vm184_vm10 = vcmp.eq.s32.totalorder %v959_v27, %v1037_v58  ;;  %vm216_vm11 = vcmp.eq.s32.totalorder %v959_v27, %v1029_v52  ;;  %v800_v59 = vsel %vm278_vm7, 1.0, %v911_v19  ;;  %vm314_vm8 = vcmask 261120  }
  0xb1   :  { %v235_v26 = vadd.f32 %v786_v36, %v203_v35  ;;  %v173_v60 = vadd.f32 %v774_v57, %v141_v55  ;;  %v781_v61 = vsel %vm184_vm10, 1.0, %v911_v19  ;;  %455 = vmatprep.mubr.f32.mxu1 %v302_v56  ;;  %v788_v62 = vsel %vm216_vm11, 1.0, %v911_v19 }
  0xb2   :  { %vm248_vm12 = vcmp.eq.s32.totalorder %v959_v27, %v1073_v10  ;;  %vm280_vm13 = vcmp.eq.s32.totalorder %v959_v27, %v1096_v41  ;;  %v112_v63 = vadd.f32 %v1020_v49, %v995_v38  ;;  %v770_v4 = vsel %vm123_vm15, 1.0, %v911_v19 }
  0xb3   :  { %v267_v0 = vadd.f32 %v793_v54, %v235_v26  ;;  %v205_v2 = vadd.f32 %v781_v61, %v173_v60  ;;  %v795_v3 = vsel %vm248_vm12, 1.0, %v911_v19  ;;  %vm155_vm14 = vcmp.eq.s32.totalorder %v965_v29, %v1009_v44 }
  0xb4   :  { %v144_v5 = vadd.f32 %v770_v4, %v112_v63  ;;  %vm187_vm1 = vcmp.eq.s32.totalorder %v965_v29, %v1037_v58  ;;  %vm219_vm2 = vcmp.eq.s32.totalorder %v965_v29, %v1029_v52  ;;  %v777_v11 = vsel %vm155_vm14, 1.0, %v911_v19 }
  0xb5   :  { %v299_v38 = vadd.f32 %v800_v59, %v267_v0  ;;  %v237_v49 = vadd.f32 %v788_v62, %v205_v2  ;;  %v784_v12 = vsel %vm187_vm1, 1.0, %v911_v19  ;;  %vm252_vm15 = vcmp.eq.s32.totalorder %v968_v30, %v1073_v10 }
  0xb6   :  { %v802_v32 = vsel %vm280_vm13, 1.0, %v911_v19  ;;  %v176_v13 = vadd.f32 %v777_v11, %v144_v5  ;;  %vm251_vm3 = vcmp.eq.s32.totalorder %v965_v29, %v1073_v10  ;;  %v791_v16 = vsel %vm219_vm2, 1.0, %v911_v19 }
  0xb7   :  { %386 = vmatmul.mubr.f32.vlgmr.msra.gmra.mxu0 %v299_v38  ;;  %v269_v14 = vadd.f32 %v795_v3, %v237_v49  ;;  %vm283_vm4 = vcmp.eq.s32.totalorder %v965_v29, %v1096_v41  ;;  %v143_v17 = vadd.f32 %v999_v40, %v1027_v51  ;;  %v776_v27 = vsel %vm154_vm6, 1.0, %v911_v19 }
  0xb8   :  { %492 = vmatpush1.xpose.msra.mxu0 %v39_v6  ;;  %v208_v18 = vadd.f32 %v784_v12, %v176_v13  ;;  %vm186_vm0 = vcmp.eq.s32.totalorder %v962_v28, %v1037_v58  ;;  %vm218_vm5 = vcmp.eq.s32.totalorder %v962_v28, %v1029_v52  ;;  %v798_v21 = vsel %vm251_vm3, 1.0, %v911_v19 }
  0xb9   :  { %v301_v20 = vadd.f32 %v802_v32, %v269_v14  ;;  %v175_v24 = vadd.f32 %v776_v27, %v143_v17  ;;  %v783_v40 = vsel %vm186_vm0, 1.0, %v911_v19  ;;  %v790_v31 = vsel %vm218_vm5, 1.0, %v911_v19 }
  0xba   :  { %v240_v51 = vadd.f32 %v791_v16, %v208_v18  ;;  %vm250_vm7 = vcmp.eq.s32.totalorder %v962_v28, %v1073_v10  ;;  %v241_v44 = vadd.f32 %v1071_v9, %v1065_v8  ;;  %v805_v52 = vsel %vm283_vm4, 1.0, %v911_v19 }
  0xbb   :  { %456 = vmatmul.mubr.f32.vlgmr.msra.gmra.mxu1 %v301_v20  ;;  %v207_v58 = vadd.f32 %v783_v40, %v175_v24  ;;  %vm282_vm6 = vcmp.eq.s32.totalorder %v962_v28, %v1096_v41  ;;  %v799_v37 = vsel %vm252_vm15, 1.0, %v911_v19  ;;  %vm914_vm9 = vmmov 0  }
  0xbc   :  { %v272_v39 = vadd.f32 %v798_v21, %v240_v51  ;;  %812 = vmatpush3.xpose.msk.msra.mxu1 %vm314_vm8, %v41_v22  ;;  %813 = vmatprep.mubr.msk.f32.mxu1 %vm914_vm9, %v911_v19  ;;  %v797_v8 = vsel %vm250_vm7, 1.0, %v911_v19  ;;  %v273_v9 = vadd.f32 %v799_v37, %v241_v44  ;;  %vm284_vm10 = vcmp.eq.s32.totalorder %v968_v30, %v1096_v41 }
  0xbd   :  { %v239_v29 = vadd.f32 %v790_v31, %v207_v58  ;;  %v806_v28 = vsel %vm284_vm10, 1.0, %v911_v19  ;;  %v804_v33 = vsel %vm282_vm6, 1.0, %v911_v19  ;;  %v604_v57 = vsub.s32 5, %v948_v23 }
  0xbe   :  { %v304_v42 = vadd.f32 %v805_v52, %v272_v39  ;;  %v305_v10 = vadd.f32 %v806_v28, %v273_v9  ;;  %v634_v59 = vsub.s32 6, %v948_v23  ;;  %v917_v2 = vmov 17  }
  0xbf   :  { %v271_v43 = vadd.f32 %v797_v8, %v239_v29  ;;  %v605_v26 = vrot.slane %v944_v15, %v604_v57  ;;  %v918_v18 = vmov 18   ;;  %vm722_vm11 = vcmask 146560  }
  0xc0   :  { %525 = vmatprep.mubr.f32.mxu0 %v304_v42  ;;  %814 = vmatmul.mubr.msk.f32.vlgmr.msra.gmra.mxu1 %vm314_vm8, %v305_v10  ;;  %v635_v0 = vrot.slane %v944_v15, %v634_v59  ;;  %vm733_vm8 = vcmask 15360  }
  0xc1   :  { %v303_v45 = vadd.f32 %v804_v33, %v271_v43 }
  0xc3   :  { %526 = vmatmul.mubr.f32.vlgmr.msra.gmra.mxu0 %v303_v45 }
 0x177   :  { %v387_v47 = vpop.f32.mrf.mxu0 }
 0x178   :  { %v388_v46 = vadd.f32 %v387_v47, %v312_v48 }
 0x179   :  { %v389_v50 = vpop.f32.mrf.mxu0 }
 0x17b   :  { %v457_v36 = vpop.f32.mrf.mxu1 }
 0x17c   :  { %v458_v30 = vadd.f32 %v457_v36, %v388_v46 }
 0x17d   :  { %v459_v53 = vpop.f32.mrf.mxu1 }
 0x180   :  { %v597_v41 = vpop.f32.mrf.mxu1 }
 0x182   :  { %v815_v34 = vpop.f32.mrf.mxu1 }
 0x183   :  { %v527_v35 = vpop.f32.mrf.mxu0 }
 0x184   :  { %v528_v54 = vadd.f32 %v527_v35, %v458_v30 }
 0x185   :  { %v529_v55 = vpop.f32.mrf.mxu0 }
 0x186   :  { %v598_v19 = vadd.f32 %v597_v41, %v528_v54 }
 0x188   :  { %v601_v56 = vmax.f32 %v598_v19, 0.0 }
 0x18a   :  { %619 = vperm.xlu0 %844, %v601_v56   ;;  %609 = vperm.xlu1 %843, %v601_v56  }
 0x18e   :  { %845 = vset.pattern.permute.xlu1 %v905_v1  ;;  %v648_v1 = vsub.s32 7, %v948_v23 }
 0x18f   :  { %629 = vperm.xlu1 %845, %v601_v56  }
 0x190   :  { %v649_v5 = vrot.slane %v944_v15, %v648_v1 }
 0x193   :  { %846 = vset.pattern.permute.xlu1 %v907_v7  ;;  %v916_v7 = vmov 16  }
 0x194   :  { %643 = vperm.xlu1 %846, %v601_v56   ;;  %847 = vset.pattern.permute.xlu0 %v916_v7 }
 0x198   :  { %848 = vset.pattern.permute.xlu1 %v917_v2 }
 0x205   :  { %v620_v60 = vpop.permute.xlu0 %619  ;;  %v610_v61 = vpop.permute.xlu1 %609 }
 0x206   :  { %v622_v62 = vmul.f32 %v620_v60, %v605_v26  ;;  %v612_v63 = vmul.f32 %v610_v61, %v952_v25 }
 0x208   :  { %624 = vrot.lane.b32.xlu1 %v622_v62, %s915_s1  ;;  %614 = vrot.lane.b32.xlu0 %v612_v63, %s915_s1 }
 0x20a   :  { %v630_v3 = vpop.permute.xlu1 %629 }
 0x20b   :  { %v636_v4 = vmul.f32 %v635_v0, %v630_v3 }
 0x20d   :  { %638 = vrot.lane.b32.xlu0 %v636_v4, %s915_s1 }
 0x20f   :  { %v644_v38 = vpop.permute.xlu1 %643 }
 0x210   :  { %v650_v49 = vmul.f32 %v649_v5, %v644_v38 }
 0x212   :  { %652 = vrot.lane.b32.xlu1 %v650_v49, %s915_s1 }
 0x27a   :  { %v615_v6 = vpop.permute.xlu0 %614  ;;  %v625_v12 = vpop.permute.xlu1 %624 }
 0x27b   :  { %v617_v11 = vadd.f32 %v615_v6, %v605_v26 }
 0x27d   :  { %v627_v32 = vadd.f32 %v625_v12, %v617_v11 }
 0x27f   :  { %v639_v13 = vpop.permute.xlu0 %638 }
 0x280   :  { %v641_v14 = vadd.f32 %v639_v13, %v627_v32 }
 0x284   :  { %v653_v16 = vpop.permute.xlu1 %652 }
 0x285   :  { %v655_v23 = vadd.f32 %v653_v16, %v641_v14 }
 0x287   :  { %v656_v17 = vmax.f32 %v655_v23, 0.0 }
 0x289   :  { %670 = vperm.xlu1 %848, %v656_v17   ;;  %660 = vperm.xlu0 %847, %v656_v17  }
 0x28d   :  { %849 = vset.pattern.permute.xlu1 %v918_v18  ;;  %851 = vset.pattern.permute.xlu0 %v917_v2 }
 0x28e   :  { %680 = vperm.xlu1 %849, %v656_v17  }
 0x292   :  { %850 = vset.pattern.permute.xlu1 %v916_v7 }
 0x304   :  { %v671_v15 = vpop.permute.xlu1 %670  ;;  %v661_v27 = vpop.permute.xlu0 %660 }
 0x305   :  { %v673_v20 = vmul.f32 %v671_v15, %v605_v26  ;;  %v663_v21 = vmul.f32 %v661_v27, %v952_v25 }
 0x307   :  { %675 = vrot.lane.b32.xlu1 %v673_v20, %s919_s19  ;;  %665 = vrot.lane.b32.xlu0 %v663_v21, %s919_s19 }
 0x309   :  { %v681_v22 = vpop.permute.xlu1 %680 }
 0x30a   :  { %v683_v24 = vmul.f32 %v681_v22, %v635_v0 }
 0x30c   :  { %685 = vrot.lane.b32.xlu0 %v683_v24, %s919_s19 }
 0x379   :  { %v666_v40 = vpop.permute.xlu0 %665  ;;  %v676_v31 = vpop.permute.xlu1 %675 }
 0x37a   :  { %v668_v51 = vadd.f32 %v666_v40, %v635_v0 }
 0x37c   :  { %v678_v44 = vadd.f32 %v676_v31, %v668_v51 }
 0x37e   :  { %v686_v52 = vpop.permute.xlu0 %685 }
 0x37f   :  { %v688_v58 = vadd.f32 %v686_v52, %v678_v44 }
 0x381   :  { %v689_v37 = vmax.f32 %v688_v58, 0.0 }
 0x383   :  { %703 = vperm.xlu0 %851, %v689_v37   ;;  %693 = vperm.xlu1 %850, %v689_v37  }
 0x387   :  { %852 = vset.pattern.permute.xlu1 %v918_v18  ;;  %853 = vset.pattern.permute.xlu0 %v918_v18 }
 0x388   :  { %713 = vperm.xlu1 %852, %v689_v37  }
 0x3fe   :  { %v704_v39 = vpop.permute.xlu0 %703  ;;  %v694_v8 = vpop.permute.xlu1 %693 }
 0x3ff   :  { %v706_v9 = vmul.f32 %v704_v39, %v605_v26  ;;  %v696_v29 = vmul.f32 %v694_v8, %v952_v25 }
 0x401   :  { %708 = vrot.lane.b32.xlu0 %v706_v9, %s920_s20  ;;  %698 = vrot.lane.b32.xlu1 %v696_v29, %s920_s20 }
 0x403   :  { %v714_v28 = vpop.permute.xlu1 %713 }
 0x404   :  { %v716_v42 = vmul.f32 %v714_v28, %v635_v0 }
 0x406   :  { %718 = vrot.lane.b32.xlu1 %v716_v42, %s920_s20 }
 0x473   :  { %v699_v33 = vpop.permute.xlu1 %698  ;;  %v709_v43 = vpop.permute.xlu0 %708 }
 0x474   :  { %v701_v10 = vadd.f32 %v699_v33, %v649_v5 }
 0x476   :  { %v711_v45 = vadd.f32 %v709_v43, %v701_v10 }
 0x478   :  { %v719_v47 = vpop.permute.xlu1 %718 }
 0x479   :  { %v721_v48 = vadd.f32 %v719_v47, %v711_v45 }
 0x47b   :  { %v723_v50 = vsel %vm722_vm11, %v721_v48, -inf }
 0x47c   :  { %724 = vmax.xlane.f32.xlu0 %v723_v50 }
 0x505   :  { %v725_v36 = vpop.xlane.xlu0 %724 }
 0x506   :  { %v726_v46 = vsub.f32 %v721_v48, %v725_v36 }
 0x508   :  { %v727_v53 = vmul.f32 1.442695, %v726_v46 }
 0x50a   :  { %854 = vpow2.f32 %v727_v53 }
 0x517   :  { %v855_v25 = vpop.eup %854 }
 0x518   :  { %730 = vrot.lane.b32.xlu1 %v855_v25, %s913_s0 }
 0x58a   :  { %v731_v30 = vpop.permute.xlu1 %730 }
 0x58b   :  { %v734_v41 = vsel %vm733_vm8, %v731_v30, 0.0 }
 0x58c   :  { %735 = vadd.xlane.f32.xlu1 %v734_v41 }
 0x615   :  { %v736_v34 = vpop.xlane.xlu1 %735 }
 0x616   :  { %856 = vlog2.f32 %v736_v34 }
 0x623   :  { %v857_v35 = vpop.eup %856 }
 0x624   :  { %v738_v54 = vmul.f32 0.6931472, %v857_v35 }
 0x626   :  { %v739_v55 = vsub.f32 %v726_v46, %v738_v54 }
 0x628   :  { %741 = vrot.lane.b32.xlu0 %v739_v55, %s913_s0 }
 0x69a   :  { %v742_v19 = vpop.permute.xlu0 %741 }
 0x69b   :  { %744 = vst.msk [vmem:[%s1214_s2] sm:$0xff] %vm733_vm8, %v742_v19 }
 0x69c   :  { %749 = vsyncpa [#allocation3], 1 }
 0x69d   :  { %750 = vsyncpa [#allocation5], 1 }

</bundles_post_ra>
